<compile_context>
chip_gen: v7x
topology: tpu7x:2x2x1
jax: 0.10.0
libtpu: 0.0.40
codegen_flags: <defaults>
</compile_context>

<pallas_src>
import jax
import jax.numpy as jnp
from jax.experimental import pallas as pl
from jax.experimental.pallas import tpu as pltpu

LANES = 128     # TPU lane width; channel axis is padded to this.
BK = 128        # contraction tile
MAX_BM = 512    # row tile: ~85% of HBM roofline, VMEM-safe on v5e/v6e/v7x


def _round_up(x, m):
    return (x + m - 1) // m * m


def _block_m(m):
    """Row tile: up to 512, never larger than the (128-rounded) problem."""
    return min(MAX_BM, _round_up(m, 128))


def _pad2(x, m0, m1):
    return jnp.pad(x, ((0, (-x.shape[0]) % m0), (0, (-x.shape[1]) % m1)))


# ----------------------------------------------------------------------------
# Pallas kernels
# ----------------------------------------------------------------------------
def _partial_col_stats(acc):
    """(bm,128) f32 -> ((8,128) col-sum partials, (8,128) col-sumsq partials).

    Rows are folded modulo 8 so the stats output block stays (8,128)-aligned;
    the tiny cross-tile reduction is finished outside the kernel in JAX.
    """
    g = acc.reshape(acc.shape[0] // 8, 8, acc.shape[1])
    return jnp.sum(g, axis=0), jnp.sum(g * g, axis=0)


def _mm_stats_k1_kernel(a_ref, b_ref, o_ref, sum_ref, sumsq_ref):
    # Single-K-tile fast path: no accumulator scratch, no predication.
    acc = jnp.dot(a_ref[...], b_ref[...], preferred_element_type=jnp.float32)
    o_ref[...] = acc
    s, s2 = _partial_col_stats(acc)
    sum_ref[...] = s
    sumsq_ref[...] = s2


def _mm_stats_kernel(a_ref, b_ref, o_ref, sum_ref, sumsq_ref, acc_ref):
    k = pl.program_id(1)

    @pl.when(k == 0)
    def _():
        acc_ref[...] = jnp.zeros_like(acc_ref)

    acc_ref[...] += jnp.dot(a_ref[...], b_ref[...],
                            preferred_element_type=jnp.float32)

    @pl.when(k == pl.num_programs(1) - 1)
    def _():
        acc = acc_ref[...]
        o_ref[...] = acc
        s, s2 = _partial_col_stats(acc)
        sum_ref[...] = s
        sumsq_ref[...] = s2


def _mm_bias_tanh_k1_kernel(a_ref, b_ref, bias_ref, o_ref):
    acc = jnp.dot(a_ref[...], b_ref[...], preferred_element_type=jnp.float32)
    o_ref[...] = jnp.tanh(acc + bias_ref[...])


def _mm_bias_tanh_kernel(a_ref, b_ref, bias_ref, o_ref, acc_ref):
    k = pl.program_id(1)

    @pl.when(k == 0)
    def _():
        acc_ref[...] = jnp.zeros_like(acc_ref)

    acc_ref[...] += jnp.dot(a_ref[...], b_ref[...],
                            preferred_element_type=jnp.float32)

    @pl.when(k == pl.num_programs(1) - 1)
    def _():
        o_ref[...] = jnp.tanh(acc_ref[...] + bias_ref[...])


def _affine_relu_kernel(x_ref, s_ref, b_ref, o_ref):
    y = x_ref[...] * s_ref[...] + b_ref[...]
    o_ref[...] = jnp.maximum(y, 0.0).astype(o_ref.dtype)


# ----------------------------------------------------------------------------
# Pallas wrappers (operate on zero-padded, 128-lane matrices)
# ----------------------------------------------------------------------------
def pallas_matmul_stats(a_p, b_p, bm):
    """(Mp,Kp)bf16 @ (Kp,128)bf16 -> conv (Mp,128) f32 plus per-M-tile column
    sum / sum-of-squares partials of shape (8*Mp//bm, 128) f32."""
    Mp, Kp = a_p.shape
    Np = b_p.shape[1]
    mt, kt = Mp // bm, Kp // BK
    out_shape = (jax.ShapeDtypeStruct((Mp, Np), jnp.float32),
                 jax.ShapeDtypeStruct((8 * mt, Np), jnp.float32),
                 jax.ShapeDtypeStruct((8 * mt, Np), jnp.float32))
    if kt == 1:
        return pl.pallas_call(
            _mm_stats_k1_kernel,
            out_shape=out_shape,
            grid_spec=pltpu.PrefetchScalarGridSpec(
                num_scalar_prefetch=0,
                grid=(mt,),
                in_specs=[pl.BlockSpec((bm, Kp), lambda i: (i, 0)),
                          pl.BlockSpec((Kp, Np), lambda i: (0, 0))],
                out_specs=(pl.BlockSpec((bm, Np), lambda i: (i, 0)),
                           pl.BlockSpec((8, Np), lambda i: (i, 0)),
                           pl.BlockSpec((8, Np), lambda i: (i, 0)))),
            compiler_params=pltpu.CompilerParams(
                dimension_semantics=("parallel",)),
        )(a_p, b_p)
    return pl.pallas_call(
        _mm_stats_kernel,
        out_shape=out_shape,
        grid_spec=pltpu.PrefetchScalarGridSpec(
            num_scalar_prefetch=0,
            grid=(mt, kt),
            in_specs=[pl.BlockSpec((bm, BK), lambda i, k: (i, k)),
                      pl.BlockSpec((BK, Np), lambda i, k: (k, 0))],
            out_specs=(pl.BlockSpec((bm, Np), lambda i, k: (i, 0)),
                       pl.BlockSpec((8, Np), lambda i, k: (i, 0)),
                       pl.BlockSpec((8, Np), lambda i, k: (i, 0))),
            scratch_shapes=[pltpu.VMEM((bm, Np), jnp.float32)]),
        compiler_params=pltpu.CompilerParams(
            dimension_semantics=("parallel", "arbitrary")),
    )(a_p, b_p)


def pallas_matmul_bias_tanh(a_p, b_p, bias_row, bm):
    """Final layer: (Mp,Kp)bf16 @ (Kp,128)bf16, fused +bias, tanh epilogue."""
    Mp, Kp = a_p.shape
    Np = b_p.shape[1]
    mt, kt = Mp // bm, Kp // BK
    out_shape = jax.ShapeDtypeStruct((Mp, Np), jnp.float32)
    if kt == 1:
        return pl.pallas_call(
            _mm_bias_tanh_k1_kernel,
            out_shape=out_shape,
            grid_spec=pltpu.PrefetchScalarGridSpec(
                num_scalar_prefetch=0,
                grid=(mt,),
                in_specs=[pl.BlockSpec((bm, Kp), lambda i: (i, 0)),
                          pl.BlockSpec((Kp, Np), lambda i: (0, 0)),
                          pl.BlockSpec((1, Np), lambda i: (0, 0))],
                out_specs=pl.BlockSpec((bm, Np), lambda i: (i, 0))),
            compiler_params=pltpu.CompilerParams(
                dimension_semantics=("parallel",)),
        )(a_p, b_p, bias_row)
    return pl.pallas_call(
        _mm_bias_tanh_kernel,
        out_shape=out_shape,
        grid_spec=pltpu.PrefetchScalarGridSpec(
            num_scalar_prefetch=0,
            grid=(mt, kt),
            in_specs=[pl.BlockSpec((bm, BK), lambda i, k: (i, k)),
                      pl.BlockSpec((BK, Np), lambda i, k: (k, 0)),
                      pl.BlockSpec((1, Np), lambda i, k: (0, 0))],
            out_specs=pl.BlockSpec((bm, Np), lambda i, k: (i, 0)),
            scratch_shapes=[pltpu.VMEM((bm, Np), jnp.float32)]),
        compiler_params=pltpu.CompilerParams(
            dimension_semantics=("parallel", "arbitrary")),
    )(a_p, b_p, bias_row)


def pallas_affine_relu(x_p, scale, shift, bm):
    """y = relu(x*scale + shift) (per-column scale/shift), bf16 output so the
    next layer's im2col already reads bf16."""
    Mp, Np = x_p.shape
    s = jnp.zeros((1, Np), jnp.float32).at[0, :scale.shape[0]].set(scale)
    b = jnp.zeros((1, Np), jnp.float32).at[0, :shift.shape[0]].set(shift)
    return pl.pallas_call(
        _affine_relu_kernel,
        out_shape=jax.ShapeDtypeStruct((Mp, Np), jnp.bfloat16),
        grid_spec=pltpu.PrefetchScalarGridSpec(
            num_scalar_prefetch=0,
            grid=(Mp // bm,),
            in_specs=[pl.BlockSpec((bm, Np), lambda i: (i, 0)),
                      pl.BlockSpec((1, Np), lambda i: (0, 0)),
                      pl.BlockSpec((1, Np), lambda i: (0, 0))],
            out_specs=pl.BlockSpec((bm, Np), lambda i: (i, 0))),
        compiler_params=pltpu.CompilerParams(
            dimension_semantics=("parallel",)),
    )(x_p, s, b)


# ----------------------------------------------------------------------------
# ConvTranspose2d lowering glue (channels-last dilate+pad+im2col; matmul is
# done in Pallas).  output_padding=0, matching nn.ConvTranspose2d defaults.
# ----------------------------------------------------------------------------
def convT_im2col_nhwc(x, w, stride, padding):
    """x:(N,IH,IW,CI) bf16 channels-last, w:(CI,CO,KH,KW) PyTorch layout.
    Returns patches:(N*OH*OW, CI*KH*KW) bf16, wmat:(CI*KH*KW, CO) bf16, dims."""
    N, IH, IW, CI = x.shape
    _, CO, KH, KW = w.shape
    DH, DW = (IH - 1) * stride + 1, (IW - 1) * stride + 1
    ph, pw = KH - 1 - padding, KW - 1 - padding
    # Dilate + pad in a single scatter into a zero buffer (no extra pad pass).
    xp = jnp.zeros((N, DH + 2 * ph, DW + 2 * pw, CI), x.dtype)
    xp = xp.at[:, ph:ph + DH:stride, pw:pw + DW:stride, :].set(x)
    OH, OW = DH + 2 * ph - KH + 1, DW + 2 * pw - KW + 1
    # TODO(synk): im2col window extraction stays as XLA glue (bf16, no
    # transposes); a data-dependent Pallas gather is not worth it at this size.
    cols = [xp[:, ky:ky + OH, kx:kx + OW, :]
            for ky in range(KH) for kx in range(KW)]
    patches = jnp.stack(cols, axis=-1)                 # (N,OH,OW,CI,KH*KW)
    patches = patches.reshape(N * OH * OW, CI * KH * KW)
    wf = w[:, :, ::-1, ::-1]                           # flip kernel spatially
    wmat = wf.transpose(1, 0, 2, 3).reshape(CO, CI * KH * KW).T
    return patches, wmat.astype(jnp.bfloat16), (N, OH, OW, CO)


# ----------------------------------------------------------------------------
# Generator
# ----------------------------------------------------------------------------
def init_generator_params(key, channels_noise, features_g):
    specs = [(channels_noise, features_g * 16, 5, 1, 0),
             (features_g * 16, features_g * 8, 4, 2, 1),
             (features_g * 8, features_g * 4, 3, 2, 1),
             (features_g * 4, features_g * 2, 4, 2, 1),
             (features_g * 2, features_g, 3, 2, 1)]
    blocks = []
    for (ci, co, k, s, p) in specs:
        key, kw = jax.random.split(key)
        blocks.append(dict(
            w=jax.random.normal(kw, (ci, co, k, k), jnp.float32) * 0.05,
            gamma=jnp.ones((co,), jnp.float32),   # PyTorch BatchNorm2d defaults
            beta=jnp.zeros((co,), jnp.float32),
            stride=s, padding=p))
    key, kw, kb = jax.random.split(key, 3)
    final = dict(w=jax.random.normal(kw, (features_g, 1, 4, 4), jnp.float32) * 0.05,
                 b=jax.random.normal(kb, (1,), jnp.float32) * 0.05,
                 stride=2, padding=1)
    return blocks, final


def generator_forward(x_nchw, blocks, final):
    eps = 1e-5
    # NCHW (PyTorch) -> channels-last; everything between layers stays NHWC /
    # bf16 so channels map to the TPU lane axis and no per-layer transposes
    # are needed.
    x = jnp.transpose(x_nchw, (0, 2, 3, 1)).astype(jnp.bfloat16)
    for blk in blocks:
        patches, wmat, (N, OH, OW, CO) = convT_im2col_nhwc(
            x, blk["w"], blk["stride"], blk["padding"])
        M = patches.shape[0]
        bm = _block_m(M)
        a_p = _pad2(patches, bm, BK)
        b_p = _pad2(wmat, BK, LANES)
        conv_p, psum, psumsq = pallas_matmul_stats(a_p, b_p, bm)
        # BatchNorm2d in training mode: biased batch stats per channel.  Zero
        # padding rows contribute 0 to the sums; divide by the true M.
        colsum = jnp.sum(psum, axis=0)[:CO]
        colsumsq = jnp.sum(psumsq, axis=0)[:CO]
        mean = colsum / M
        var = jnp.maximum(colsumsq / M - mean * mean, 0.0)   # fp-cancel clamp
        inv = jax.lax.rsqrt(var + eps)
        scale = blk["gamma"] * inv
        shift = blk["beta"] - mean * scale
        y_p = pallas_affine_relu(conv_p, scale, shift, bm)
        x = y_p[:M, :CO].reshape(N, OH, OW, CO)
    # Final ConvTranspose2d (with bias) + Tanh, fused into the matmul epilogue.
    patches, wmat, (N, OH, OW, CO) = convT_im2col_nhwc(
        x, final["w"], final["stride"], final["padding"])
    M = patches.shape[0]
    bm = _block_m(M)
    a_p = _pad2(patches, bm, BK)
    b_p = _pad2(wmat, BK, LANES)
    bias = jnp.zeros((1, LANES), jnp.float32).at[0, :CO].set(final["b"])
    y_p = pallas_matmul_bias_tanh(a_p, b_p, bias, bm)
    y = y_p[:M, :CO].reshape(N, OH, OW, CO)
    return jnp.transpose(y, (0, 3, 1, 2))                    # back to NCHW


if __name__ == "__main__":
    channels_noise, channels_img, features_g = 8, 1, 4
    batch = 2
    key = jax.random.PRNGKey(0)
    key, kx = jax.random.split(key)
    # DCGAN generator consumes a (N, channels_noise, 1, 1) latent.
    x = jax.random.normal(kx, (batch, channels_noise, 1, 1), jnp.float32)

    blocks, final = init_generator_params(key, channels_noise, features_g)
    out = jax.block_until_ready(generator_forward(x, blocks, final))

    assert out.shape == (batch, 1, 150, 150), out.shape
    assert bool(jnp.all(jnp.isfinite(out)))
    assert bool(jnp.all(jnp.abs(out) <= 1.0 + 1e-6))   # tanh range
    print("KERNEL_OK")
</pallas_src>

<mosaic_0001>
module attributes {stable_mosaic.version = 11 : i64} {
  func.func @_mm_stats_kernel(%arg0: i32, %arg1: i32, %arg2: memref<128x128xbf16, #tpu.memory_space<vmem>>, %arg3: memref<128x128xbf16, #tpu.memory_space<vmem>>, %arg4: memref<128x128xf32, #tpu.memory_space<vmem>>, %arg5: memref<8x128xf32, #tpu.memory_space<vmem>>, %arg6: memref<8x128xf32, #tpu.memory_space<vmem>>, %arg7: memref<128x128xf32, #tpu.memory_space<vmem>>) attributes {dimension_semantics = [#tpu.dimension_semantics<parallel>, #tpu.dimension_semantics<arbitrary>], iteration_bounds = array<i64: 1, 2>, scalar_prefetch = 0 : i64, scratch_operands = 1 : i64, tpu.core_type = #tpu.core_type<tc>, window_params = [{transform_indices = @transform_0, window_bounds = array<i64: 128, 128>}, {transform_indices = @transform_1, window_bounds = array<i64: 128, 128>}, {transform_indices = @transform_2, window_bounds = array<i64: 128, 128>}, {transform_indices = @transform_3, window_bounds = array<i64: 8, 128>}, {transform_indices = @transform_4, window_bounds = array<i64: 8, 128>}]} {
    %c0_i32 = arith.constant 0 : i32
    %0 = arith.cmpi eq, %arg1, %c0_i32 : i32
    %1 = arith.extui %0 : i1 to i32
    %c0_i32_0 = arith.constant 0 : i32
    %2 = arith.cmpi ne, %1, %c0_i32_0 : i32
    scf.if %2 {
      %cst_9 = arith.constant 0.000000e+00 : f32
      %12 = vector.broadcast %cst_9 : f32 to vector<128x128xf32>
      %c0_10 = arith.constant 0 : index
      %c0_11 = arith.constant 0 : index
      %13 = vector.load %arg7[%c0_10, %c0_11] : memref<128x128xf32, #tpu.memory_space<vmem>>, vector<128x128xf32>
      tpu.vector_store %arg7[%c0_10, %c0_11], %12 {strides = array<i32>} : memref<128x128xf32, #tpu.memory_space<vmem>>, vector<128x128xf32>,
    } else {
    }
    %c0 = arith.constant 0 : index
    %c0_1 = arith.constant 0 : index
    %3 = vector.load %arg7[%c0, %c0_1] : memref<128x128xf32, #tpu.memory_space<vmem>>, vector<128x128xf32>
    %c0_2 = arith.constant 0 : index
    %c0_3 = arith.constant 0 : index
    %4 = vector.load %arg2[%c0_2, %c0_3] : memref<128x128xbf16, #tpu.memory_space<vmem>>, vector<128x128xbf16>
    %c0_4 = arith.constant 0 : index
    %c0_5 = arith.constant 0 : index
    %5 = vector.load %arg3[%c0_4, %c0_5] : memref<128x128xbf16, #tpu.memory_space<vmem>>, vector<128x128xbf16>
    %cst = arith.constant dense<0.000000e+00> : vector<128x128xf32>
    %6 = tpu.matmul %4, %5, %cst {dimension_numbers = #tpu.dot_dimension_numbers<[1], [0], [0], [1], [0, 0, 1, 1], [], []>} : vector<128x128xbf16>, vector<128x128xbf16>, vector<128x128xf32> -> vector<128x128xf32>
    %7 = arith.addf %3, %6 : vector<128x128xf32>
    %c0_6 = arith.constant 0 : index
    %c0_7 = arith.constant 0 : index
    %8 = vector.load %arg7[%c0_6, %c0_7] : memref<128x128xf32, #tpu.memory_space<vmem>>, vector<128x128xf32>
    tpu.vector_store %arg7[%c0_6, %c0_7], %7 {strides = array<i32>} : memref<128x128xf32, #tpu.memory_space<vmem>>, vector<128x128xf32>,
    %c1_i32 = arith.constant 1 : i32
    %9 = arith.cmpi eq, %arg1, %c1_i32 : i32
    %10 = arith.extui %9 : i1 to i32
    %c0_i32_8 = arith.constant 0 : i32
    %11 = arith.cmpi ne, %10, %c0_i32_8 : i32
    scf.if %11 {
      %c0_9 = arith.constant 0 : index
      %c0_10 = arith.constant 0 : index
      %12 = vector.load %arg7[%c0_9, %c0_10] : memref<128x128xf32, #tpu.memory_space<vmem>>, vector<128x128xf32>
      %c0_11 = arith.constant 0 : index
      %c0_12 = arith.constant 0 : index
      %13 = vector.load %arg4[%c0_11, %c0_12] : memref<128x128xf32, #tpu.memory_space<vmem>>, vector<128x128xf32>
      tpu.vector_store %arg4[%c0_11, %c0_12], %12 {strides = array<i32>} : memref<128x128xf32, #tpu.memory_space<vmem>>, vector<128x128xf32>,
      %14 = vector.shape_cast %12 : vector<128x128xf32> to vector<16x8x128xf32>
      %cst_13 = arith.constant dense<0.000000e+00> : vector<8x128xf32>
      %15 = vector.multi_reduction <add>, %14, %cst_13 [0] : vector<16x8x128xf32> to vector<8x128xf32>
      %16 = arith.mulf %14, %14 : vector<16x8x128xf32>
      %cst_14 = arith.constant dense<0.000000e+00> : vector<8x128xf32>
      %17 = vector.multi_reduction <add>, %16, %cst_14 [0] : vector<16x8x128xf32> to vector<8x128xf32>
      %c0_15 = arith.constant 0 : index
      %c0_16 = arith.constant 0 : index
      %18 = vector.load %arg5[%c0_15, %c0_16] : memref<8x128xf32, #tpu.memory_space<vmem>>, vector<8x128xf32>
      tpu.vector_store %arg5[%c0_15, %c0_16], %15 {strides = array<i32>} : memref<8x128xf32, #tpu.memory_space<vmem>>, vector<8x128xf32>,
      %c0_17 = arith.constant 0 : index
      %c0_18 = arith.constant 0 : index
      %19 = vector.load %arg6[%c0_17, %c0_18] : memref<8x128xf32, #tpu.memory_space<vmem>>, vector<8x128xf32>
      tpu.vector_store %arg6[%c0_17, %c0_18], %17 {strides = array<i32>} : memref<8x128xf32, #tpu.memory_space<vmem>>, vector<8x128xf32>,
    } else {
    }
    return
  }
  func.func @transform_0(%arg0: i32, %arg1: i32) -> (i32, i32) {
    %c0_i32 = arith.constant 0 : i32
    return %arg0, %arg1 : i32, i32
  }
  func.func @transform_1(%arg0: i32, %arg1: i32) -> (i32, i32) {
    %c0_i32 = arith.constant 0 : i32
    %c0_i32_0 = arith.constant 0 : i32
    return %arg1, %c0_i32 : i32, i32
  }
  func.func @transform_2(%arg0: i32, %arg1: i32) -> (i32, i32) {
    %c0_i32 = arith.constant 0 : i32
    %c0_i32_0 = arith.constant 0 : i32
    return %arg0, %c0_i32 : i32, i32
  }
  func.func @transform_3(%arg0: i32, %arg1: i32) -> (i32, i32) {
    %c0_i32 = arith.constant 0 : i32
    %c0_i32_0 = arith.constant 0 : i32
    return %arg0, %c0_i32 : i32, i32
  }
  func.func @transform_4(%arg0: i32, %arg1: i32) -> (i32, i32) {
    %c0_i32 = arith.constant 0 : i32
    %c0_i32_0 = arith.constant 0 : i32
    return %arg0, %c0_i32 : i32, i32
  }
}

</mosaic_0001>

<bundles_post_ra>
// kernel: tpu_custom_call.1
= control target key start
LH: loop header
LB: loop body
LE: loop exit
PB: predicated region body
PF: predicated region fallthrough
CT: control target
= control target key end

     0   :  { %10 = vsyncpa [#allocation4], 0  ;;  %s1513_s0 = inlined_call_operand.hbm [shape: bf16[128,256], index: 0, kind: input, shape index: {}]   ;;  %s1514_s1 = inlined_call_operand.hbm [shape: bf16[256,128], index: 1, kind: input, shape index: {}]   ;;  %s1515_s2 = inlined_call_operand.hbm [shape: f32[128,128], index: 2, kind: output, shape index: {0}]   ;;  %s1516_s3 = inlined_call_operand.hbm [shape: f32[8,128], index: 3, kind: output, shape index: {1}]   ;;  %s1517_s4 = inlined_call_operand.hbm [shape: f32[8,128], index: 4, kind: output, shape index: {2}]  }
   0x1   :  { %12 = vsyncpa [#allocation4 + $0x1], 0 }
   0x2   :  { %13 = vsyncpa [#allocation7], 0 }
   0x3   :  { %15 = vsyncpa [#allocation7 + $0x1], 0 }
   0x4   :  { %16 = vsyncpa [#allocation5], 0 }
   0x5   :  { %17 = vsyncpa [#allocation10], 0  ;;  %s1244_s15 = smov 0   ;;  %s1246_s16 = smov 0  }
   0x6   :  { %s1248_s17 = smov 0   ;;  %s1250_s18 = smov 0  }
   0x7   :  { %s1252_s19 = smov 0   ;;  %s1254_s20 = smov 0  }
   0x8 LB: > { %s801_s21 = sadd.s32 4294967295, %s1206_s20   ;;  %s32_s22 = sadd.s32 1, %s1202_s19  ;;  %s1206_s20 = sphi %s1254_s20, %s23_s20   ;;  %s1202_s19 = sphi %s1252_s19, %s1530_s19   ;;  %s1198_s18 = sphi %s1250_s18, %s1529_s18   ;;  %s1194_s17 = sphi %s1248_s17, %s1528_s17   ;;  %s1190_s16 = sphi %s1246_s16, %s1527_s16   ;;  %s1186_s15 = sphi %s1244_s15, %s1526_s15  }
   0x9   : > { %p33_p0 = scmp.ge.s32.totalorder %s32_s22, 2  ;;  %s44_s23 = sadd.s32 1, %s1194_s17 }
   0xa   : > { %p51_p1 = scmp.ne.s32.totalorder %s1194_s17, %s1190_s16  ;;  %p52_p2 = scmp.eq.s32.totalorder %s1206_s20, 0 }
   0xb   : > { %s1532_s22 = smov (%p33_p0, %s32_s22), 0  ;;  %p57_p4 = scmp.ne.s32.totalorder %s1190_s16, %s1186_s15 }
   0xc   : > { %p1280_p3 = por %p52_p2, %p51_p1  ;;  %s40_s25 = ssub.s32 %s1202_s19, %s1532_s22 }
   0xd   : > { %p58_p5 = scmp.eq.s32.totalorder %s801_s21, 0  ;;  %p42_p6 = scmp.eq.s32.totalorder %s40_s25, 0 }
   0xe   : > { %p926_p8 = scmp.lt.s32.totalorder %s1206_s20, 2  ;;  %s1298_s28 = sand.u32 1, %s1194_s17  }
   0xf   : > { %p1289_p7 = por %p58_p5, %p57_p4  ;;  %s805_s29 = sshll.u32 %s1202_s19, 6 }
  0x10   : > { %s1295_s27 = scalar_select %p42_p6, %s1194_s17, %s44_s23  }
  0x11   : > { %s1520_s26 = scalar_select %p1289_p7, 1, 0 }
  0x12   : > { %s804_s30 = sshll.u32 %s1298_s28, 6  ;;  %s1305_s7 = scalar_lea.hbm %s1513_s0, %s805_s29 }
  0x13   : > { %s189_s8 = scalar_lea.vmem [#allocation3], %s804_s30  ;;  %p1311_p9 = pnand %p926_p8, %p1280_p3 }
  0x14   : > { %s198_s9 = sshll.u32 %s189_s8, 4  ;;  %s186_s11 = scalar_lea.sflag [#allocation4], %s1298_s28  ;;  %s1315_s9 = int_to_ptr.vmem [resolvable:$true] %s198_s9 }
  0x15   : > { %s1006_s12 = scalar_lea.hbm %s1305_s7, 1024  ;;  %p1008_p12 = pneg %p1311_p9 }
  0x16   : > { %p1007_p11 = scmp.ne.s32.totalorder %s1305_s7, %s1006_s12  ;;  %s1011_s15 = scalar_lea.hbm %s1513_s0, 2048 }
  0x17   : > { %p1012_p1 = scmp.lt.u32.totalorder %s1305_s7, %s1513_s0  ;;  %p1013_p2 = scmp.lt.u32.totalorder %s1011_s15, %s1006_s12 }
  0x18   : > { %p1009_p13 = pnand %p1008_p12, %p1007_p11  ;;  %p1015_p4 = scmp.lt.u32.totalorder %s1006_s12, %s1305_s7 }
  0x19   : > { %p1014_p3 = por %p1013_p2, %p1012_p1 }
  0x1a   : > { %p1010_p0 = pneg %p1009_p13 }
  0x1b   : > { %p1016_p5 = por %p1015_p4, %p1014_p3 }
  0x1d   : > { %p1017_p6 = pnand %p1016_p5, %p1010_p0 }
  0x1f   : > { %1020 = shalt.err (!%p1017_p6)
}
  0x20   : > { %s1021_s25 = scalar_lea.vmem %s1315_s9, 1024  ;;  %s1208_s29 = smov [#allocation3]  }
  0x21   : > { %p1022_p8 = scmp.ne.s32.totalorder %s1315_s9, %s1021_s25  ;;  %s1026_s5 = sshll.u32 %s1208_s29, 4  ;;  %s1027_s5 = int_to_ptr.vmem [resolvable:$false] %s1026_s5 }
  0x22   : > { %s1028_s6 = scalar_lea.vmem %s1027_s5, 2048  ;;  %p1029_p10 = scmp.lt.s32.totalorder %s1315_s9, %s1027_s5 }
  0x23   : > { %p1024_p11 = pnand %p1022_p8, %p1008_p12  ;;  %p1030_p1 = scmp.lt.s32.totalorder %s1028_s6, %s1021_s25 }
  0x25   : > { %p1025_p13 = pneg %p1024_p11  ;;  %p1031_p2 = por %p1030_p1, %p1029_p10 }
  0x27   : > { %p1032_p3 = pnand %p1031_p2, %p1025_p13 }
  0x29   : > { %1035 = shalt.err (!%p1032_p3)
}
  0x2a   : > { %s1209_s8 = smov 128   ;;  %s1210_s12 = smov 64  }
  0x2b   : > { %s1211_s13 = smov 4   ;;  %p227_p10 = scmp.lt.s32.totalorder %s1206_s20, 3 }
  0x2c   : > { %922 = dma.hbm_to_vmem [thread:$0]  (!%p1311_p9), %s1305_s7, 1024, %s1315_s9, %s186_s11, %s1209_s8, %s1210_s12, %s1211_s13  }
  0x2d   : > { %s838_s14 = sshll.u32 %s1202_s19, 10  ;;  %p1522_p0 = scmp.ge.s32.totalorder %s1206_s20, 1 }
  0x2e   : > { %s1359_s25 = scalar_lea.hbm %s1514_s1, %s838_s14  ;;  %s212_s29 = scalar_lea.vmem [#allocation6], %s804_s30 }
  0x2f   : > { %p1352_p4 = pnand %p1522_p0, %p227_p10  ;;  %s219_s5 = sshll.u32 %s212_s29, 4  ;;  %s1363_s5 = int_to_ptr.vmem [resolvable:$true] %s219_s5 }
  0x30   : > { %s209_s7 = scalar_lea.sflag [#allocation7], %s1298_s28  ;;  %s1036_s9 = scalar_lea.hbm %s1359_s25, 1024 }
  0x31   : > { %p1037_p5 = scmp.ne.s32.totalorder %s1359_s25, %s1036_s9  ;;  %s1041_s8 = scalar_lea.hbm %s1514_s1, 2048 }
  0x32   : > { %p1042_p11 = scmp.lt.u32.totalorder %s1359_s25, %s1514_s1  ;;  %p1043_p13 = scmp.lt.u32.totalorder %s1041_s8, %s1036_s9 }
  0x33   : > { %p1039_p6 = pnand %p1037_p5, %p1008_p12  ;;  %p1045_p2 = scmp.lt.u32.totalorder %s1036_s9, %s1359_s25 }
  0x34   : > { %p1044_p1 = por %p1043_p13, %p1042_p11 }
  0x35   : > { %p1040_p8 = pneg %p1039_p6 }
  0x36   : > { %p1046_p3 = por %p1045_p2, %p1044_p1 }
  0x38   : > { %p1047_p10 = pnand %p1046_p3, %p1040_p8 }
  0x3a   : > { %1050 = shalt.err (!%p1047_p10)
}
  0x3b   : > { %s1051_s30 = scalar_lea.vmem %s1363_s5, 1024  ;;  %s1212_s24 = smov [#allocation6]  }
  0x3c   : > { %p1052_p0 = scmp.ne.s32.totalorder %s1363_s5, %s1051_s30  ;;  %s1056_s29 = sshll.u32 %s1212_s24, 4  ;;  %s1057_s29 = int_to_ptr.vmem [resolvable:$false] %s1056_s29 }
  0x3d   : > { %s1058_s11 = scalar_lea.vmem %s1057_s29, 2048  ;;  %p1059_p7 = scmp.lt.s32.totalorder %s1363_s5, %s1057_s29 }
  0x3e   : > { %p1054_p5 = pnand %p1052_p0, %p1008_p12  ;;  %p1060_p11 = scmp.lt.s32.totalorder %s1058_s11, %s1051_s30 }
  0x40   : > { %p1055_p6 = pneg %p1054_p5  ;;  %p1061_p13 = por %p1060_p11, %p1059_p7 }
  0x42   : > { %p1062_p1 = pnand %p1061_p13, %p1055_p6 }
  0x44   : > { %1065 = shalt.err (!%p1062_p1)
}
  0x45   : > { %925 = dma.hbm_to_vmem [thread:$0]  (!%p1311_p9), %s1359_s25, 1024, %s1363_s5, %s209_s7, %s1210_s12, %s1210_s12, %s1211_s13  }
  0x46   : > { %231 = sbr.rel (%p1352_p4) target bundleno = 455 (0x1c7), region = 28  ;;  %s233_s9 = sand.u32 (!%p1352_p4), 1, %s1190_s16  }
  0x47   : > { %s810_s6 = sshll.u32 (!%p1352_p4), %s233_s9, 6  ;;  %s234_s8 = scalar_lea.sflag (!%p1352_p4), [#allocation4], %s233_s9 }
  0x48   : > { %s1397_s14 = scalar_lea.vmem (!%p1352_p4), [#allocation3], %s810_s6  ;;  %p1524_p7 = scmp.ne.s32.totalorder (!%p1352_p4), %s1520_s26, 0 }
  0x4d   : > { %1169 = dma.done.wait (%p1524_p7), %s234_s8, 1024  }
  0x4e   : > { %1171 = vsyncadd (%p1524_p7), %s234_s8, 4294966272  ;;  %s243_s28 = scalar_lea.sflag [#allocation7], %s233_s9  ;;  %s1403_s10 = scalar_lea.vmem [#allocation6], %s810_s6 }
  0x4f   : > { %1173 = dma.done.wait (%p1524_p7), %s243_s28, 1024  }
  0x50   : > { %1175 = vsyncadd (%p1524_p7), %s243_s28, 4294966272  ;;  %p812_p9 = scmp.ne.s32.totalorder %s1198_s18, 0 }
  0x51   : > { %v1213_v0 = vmov (!%p812_p9), 0.0  }
  0x52   : > { %278 = sbr.rel (%p812_p9) target bundleno = 90 (0x5a), region = 40  ;;  %279 = vst [vmem:[#allocation2] sm:$0xff] (!%p812_p9), %v1213_v0  ;;  %280 = vst [vmem:[#allocation2 + $0x8] sm:$0xff] (!%p812_p9), %v1213_v0 }
  0x53   : > { %281 = vst [vmem:[#allocation2 + $0x10] sm:$0xff] (!%p812_p9), %v1213_v0  ;;  %282 = vst [vmem:[#allocation2 + $0x18] sm:$0xff] (!%p812_p9), %v1213_v0 }
  0x54   : > { %283 = vst [vmem:[#allocation2 + $0x20] sm:$0xff] (!%p812_p9), %v1213_v0  ;;  %284 = vst [vmem:[#allocation2 + $0x28] sm:$0xff] (!%p812_p9), %v1213_v0 }
  0x55   : > { %285 = vst [vmem:[#allocation2 + $0x30] sm:$0xff] (!%p812_p9), %v1213_v0  ;;  %286 = vst [vmem:[#allocation2 + $0x38] sm:$0xff] (!%p812_p9), %v1213_v0 }
  0x56   : > { %287 = vst [vmem:[#allocation2 + $0x40] sm:$0xff] (!%p812_p9), %v1213_v0  ;;  %288 = vst [vmem:[#allocation2 + $0x48] sm:$0xff] (!%p812_p9), %v1213_v0 }
  0x57   : > { %289 = vst [vmem:[#allocation2 + $0x50] sm:$0xff] (!%p812_p9), %v1213_v0  ;;  %290 = vst [vmem:[#allocation2 + $0x58] sm:$0xff] (!%p812_p9), %v1213_v0 }
  0x58   : > { %291 = vst [vmem:[#allocation2 + $0x60] sm:$0xff] (!%p812_p9), %v1213_v0  ;;  %292 = vst [vmem:[#allocation2 + $0x68] sm:$0xff] (!%p812_p9), %v1213_v0 }
  0x59   : > { %293 = vst [vmem:[#allocation2 + $0x70] sm:$0xff] %v1213_v0  ;;  %294 = vst [vmem:[#allocation2 + $0x78] sm:$0xff] %v1213_v0 }
  0x5a PF: > { %v990_v1 = vld [vmem:[%s1403_s10] sm:$0xff]   ;;  %v991_v2 = vld [vmem:[%s1403_s10 + $0x8] sm:$0xff]   ;;  %v992_v3 = vld [vmem:[%s1403_s10 + $0x10] sm:$0xff]   ;;  %p829_p12 = scmp.ne.s32.totalorder %s1198_s18, 1 }
  0x5b   : > { %855 = vmatprep.subr.bf16.mxu0 %v990_v1  ;;  %887 = vmatprep.subr.bf16.mxu1 %v990_v1  ;;  %v993_v4 = vld [vmem:[%s1403_s10 + $0x18] sm:$0xff]   ;;  %v998_v5 = vld [vmem:[%s1397_s14] sm:$0xff]   ;;  %v995_v8 = vld [vmem:[%s1403_s10 + $0x28] sm:$0xff]  }
  0x5c   : > { %856 = vmatpush3.bf16.msra.mxu0 %v990_v1  ;;  %895 = vmatpush3.bf16.msra.mxu1 %v990_v1  ;;  %v999_v6 = vld [vmem:[%s1397_s14 + $0x20] sm:$0xff]   ;;  %v996_v9 = vld [vmem:[%s1403_s10 + $0x30] sm:$0xff]   ;;  %v997_v10 = vld [vmem:[%s1403_s10 + $0x38] sm:$0xff]  }
  0x5d   : > { %857 = vmatprep.subr.bf16.mxu0 %v991_v2  ;;  %888 = vmatprep.subr.bf16.mxu1 %v991_v2  ;;  %v994_v7 = vld [vmem:[%s1403_s10 + $0x20] sm:$0xff]   ;;  %v1000_v11 = vld [vmem:[%s1397_s14 + $0x8] sm:$0xff]   ;;  %v1002_v13 = vld [vmem:[%s1397_s14 + $0x10] sm:$0xff]  }
  0x5e   : > { %871 = vmatprep.mubr.bf16.mxu0 %v998_v5  ;;  %879 = vmatprep.mubr.bf16.mxu1 %v999_v6  ;;  %v1001_v12 = vld [vmem:[%s1397_s14 + $0x28] sm:$0xff]   ;;  %v1003_v14 = vld [vmem:[%s1397_s14 + $0x30] sm:$0xff]   ;;  %v1004_v15 = vld [vmem:[%s1397_s14 + $0x18] sm:$0xff]  }
  0x5f   : > { %v1005_v16 = vld [vmem:[%s1397_s14 + $0x38] sm:$0xff]   ;;  %v297_v17 = vld [vmem:[#allocation2 + $0x10] sm:$0xff]  ;;  %v295_v19 = vld [vmem:[#allocation2] sm:$0xff] }
  0x60   : > { %858 = vmatpush3.bf16.msra.mxu0 %v991_v2  ;;  %896 = vmatpush3.bf16.msra.mxu1 %v991_v2  ;;  %v305_v18 = vld [vmem:[#allocation2 + $0x50] sm:$0xff]  ;;  %v303_v20 = vld [vmem:[#allocation2 + $0x40] sm:$0xff]  ;;  %v298_v23 = vld [vmem:[#allocation2 + $0x18] sm:$0xff] }
  0x61   : > { %859 = vmatprep.subr.bf16.mxu0 %v992_v3  ;;  %889 = vmatprep.subr.bf16.mxu1 %v992_v3  ;;  %v306_v24 = vld [vmem:[#allocation2 + $0x58] sm:$0xff]  ;;  %v296_v29 = vld [vmem:[#allocation2 + $0x8] sm:$0xff]  ;;  %v301_v41 = vld [vmem:[#allocation2 + $0x30] sm:$0xff] }
  0x62   : > { %v304_v30 = vld [vmem:[#allocation2 + $0x48] sm:$0xff]  ;;  %v309_v42 = vld [vmem:[#allocation2 + $0x70] sm:$0xff]  ;;  %v299_v43 = vld [vmem:[#allocation2 + $0x20] sm:$0xff] }
  0x63   : > { %v307_v44 = vld [vmem:[#allocation2 + $0x60] sm:$0xff]  ;;  %v302_v47 = vld [vmem:[#allocation2 + $0x38] sm:$0xff]  ;;  %v300_v53 = vld [vmem:[#allocation2 + $0x28] sm:$0xff] }
  0x64   : > { %860 = vmatpush3.bf16.msra.mxu0 %v992_v3  ;;  %897 = vmatpush3.bf16.msra.mxu1 %v992_v3  ;;  %v310_v48 = vld [vmem:[#allocation2 + $0x78] sm:$0xff]  ;;  %v308_v54 = vld [vmem:[#allocation2 + $0x68] sm:$0xff] }
  0x65   : > { %861 = vmatprep.subr.bf16.mxu0 %v993_v4  ;;  %890 = vmatprep.subr.bf16.mxu1 %v993_v4 }
  0x68   : > { %862 = vmatpush3.bf16.msra.mxu0 %v993_v4  ;;  %898 = vmatpush3.bf16.msra.mxu1 %v993_v4 }
  0x69   : > { %863 = vmatprep.subr.bf16.mxu0 %v994_v7  ;;  %891 = vmatprep.subr.bf16.mxu1 %v994_v7 }
  0x6c   : > { %864 = vmatpush3.bf16.msra.mxu0 %v994_v7  ;;  %899 = vmatpush3.bf16.msra.mxu1 %v994_v7 }
  0x6d   : > { %865 = vmatprep.subr.bf16.mxu0 %v995_v8  ;;  %892 = vmatprep.subr.bf16.mxu1 %v995_v8 }
  0x70   : > { %866 = vmatpush3.bf16.msra.mxu0 %v995_v8  ;;  %900 = vmatpush3.bf16.msra.mxu1 %v995_v8 }
  0x71   : > { %867 = vmatprep.subr.bf16.mxu0 %v996_v9  ;;  %893 = vmatprep.subr.bf16.mxu1 %v996_v9 }
  0x74   : > { %868 = vmatpush3.bf16.msra.mxu0 %v996_v9  ;;  %901 = vmatpush3.bf16.msra.mxu1 %v996_v9 }
  0x75   : > { %869 = vmatprep.subr.bf16.mxu0 %v997_v10  ;;  %894 = vmatprep.subr.bf16.mxu1 %v997_v10 }
  0x78   : > { %870 = vmatpush3.bf16.msra.mxu0 %v997_v10  ;;  %902 = vmatpush3.bf16.msra.mxu1 %v997_v10 }
  0x7b   : > { %872 = vmatmul.mubr.bf16.vlgmr.msra.gmra.mrb[0].mxu0 %v1000_v11  ;;  %880 = vmatmul.mubr.bf16.vlgmr.msra.gmra.mrb[0].mxu1 %v1001_v12 }
  0x7c   : > { %875 = vmatprep.mubr.bf16.mxu0 %v1002_v13  ;;  %883 = vmatprep.mubr.bf16.mxu1 %v1003_v14 }
  0x83   : > { %876 = vmatmul.mubr.bf16.gmra.mrb[4].mxu0 %v1004_v15  ;;  %884 = vmatmul.mubr.bf16.gmra.mrb[4].mxu1 %v1005_v16 }
 0x14e   : > { %v873_v21 = vpop.f32.mrb[0].mxu0  ;;  %v881_v22 = vpop.f32.mrb[0].mxu1 }
 0x14f   : > { %v538_v25 = vadd.f32 %v873_v21, %v297_v17  ;;  %v546_v26 = vadd.f32 %v881_v22, %v305_v18  ;;  %v473_v27 = vpop.f32.mrb[1].mxu0  ;;  %v505_v28 = vpop.f32.mrb[1].mxu1 }
 0x150   : > { %v536_v31 = vadd.f32 %v473_v27, %v295_v19  ;;  %v544_v32 = vadd.f32 %v505_v28, %v303_v20  ;;  %v874_v33 = vpop.f32.mrb[2].mxu0  ;;  %v882_v34 = vpop.f32.mrb[2].mxu1 }
 0x151   : > { %554 = vst [vmem:[#allocation2 + $0x10] sm:$0xff] %v538_v25  ;;  %562 = vst [vmem:[#allocation2 + $0x50] sm:$0xff] %v546_v26  ;;  %v539_v35 = vadd.f32 %v874_v33, %v298_v23  ;;  %v547_v36 = vadd.f32 %v882_v34, %v306_v24  ;;  %v476_v37 = vpop.f32.mrb[3].mxu0  ;;  %v508_v38 = vpop.f32.mrb[3].mxu1 }
 0x152   : > { %552 = vst [vmem:[#allocation2] sm:$0xff] %v536_v31  ;;  %560 = vst [vmem:[#allocation2 + $0x40] sm:$0xff] %v544_v32  ;;  %v537_v39 = vadd.f32 %v476_v37, %v296_v29  ;;  %v545_v40 = vadd.f32 %v508_v38, %v304_v30 }
 0x153   : > { %555 = vst [vmem:[#allocation2 + $0x18] sm:$0xff] %v539_v35  ;;  %563 = vst [vmem:[#allocation2 + $0x58] sm:$0xff] %v547_v36 }
 0x154   : > { %553 = vst [vmem:[#allocation2 + $0x8] sm:$0xff] %v537_v39  ;;  %561 = vst [vmem:[#allocation2 + $0x48] sm:$0xff] %v545_v40 }
 0x156   : > { %v877_v45 = vpop.f32.mrb[4].mxu0  ;;  %v885_v46 = vpop.f32.mrb[4].mxu1  ;;  %571 = sbr.rel (%p829_p12) target bundleno = 381 (0x17d), region = 44 }
 0x157   : > { %v542_v49 = vadd.f32 %v877_v45, %v301_v41  ;;  %v550_v50 = vadd.f32 %v885_v46, %v309_v42  ;;  %v489_v51 = vpop.f32.mrb[5].mxu0  ;;  %v521_v52 = vpop.f32.mrb[5].mxu1 }
 0x158   : > { %v540_v55 = vadd.f32 %v489_v51, %v299_v43  ;;  %v548_v56 = vadd.f32 %v521_v52, %v307_v44  ;;  %v878_v57 = vpop.f32.mrb[6].mxu0  ;;  %v886_v58 = vpop.f32.mrb[6].mxu1  ;;  %v574_v3 = vld [vmem:[#allocation2 + $0x10] sm:$0xff] (!%p829_p12) }
 0x159   : > { %558 = vst [vmem:[#allocation2 + $0x30] sm:$0xff] %v542_v49  ;;  %566 = vst [vmem:[#allocation2 + $0x70] sm:$0xff] %v550_v50  ;;  %v543_v59 = vadd.f32 %v878_v57, %v302_v47  ;;  %v551_v60 = vadd.f32 %v886_v58, %v310_v48  ;;  %v492_v61 = vpop.f32.mrb[7].mxu0  ;;  %v524_v62 = vpop.f32.mrb[7].mxu1  ;;  %v572_v1 = vld [vmem:[#allocation2] sm:$0xff] (!%p829_p12)  ;;  %v621_v7 = vmul.f32 (!%p829_p12), %v574_v3, %v574_v3  ;;  %v582_v18 = vld [vmem:[#allocation2 + $0x50] sm:$0xff] (!%p829_p12) }
 0x15a   : > { %556 = vst [vmem:[#allocation2 + $0x20] sm:$0xff] %v540_v55  ;;  %564 = vst [vmem:[#allocation2 + $0x60] sm:$0xff] %v548_v56  ;;  %v541_v63 = vadd.f32 %v492_v61, %v300_v53  ;;  %v549_v0 = vadd.f32 %v524_v62, %v308_v54  ;;  %v619_v4 = vmul.f32 (!%p829_p12), %v572_v1, %v572_v1  ;;  %v575_v8 = vld [vmem:[#allocation2 + $0x18] sm:$0xff] (!%p829_p12)  ;;  %v580_v13 = vld [vmem:[#allocation2 + $0x40] sm:$0xff] (!%p829_p12) }
 0x15b   : > { %559 = vst [vmem:[#allocation2 + $0x38] sm:$0xff] %v543_v59  ;;  %567 = vst [vmem:[#allocation2 + $0x78] sm:$0xff] %v551_v60  ;;  %v573_v2 = vld [vmem:[#allocation2 + $0x8] sm:$0xff] (!%p829_p12)  ;;  %v622_v16 = vmul.f32 (!%p829_p12), %v575_v8, %v575_v8  ;;  %v583_v19 = vld [vmem:[#allocation2 + $0x58] sm:$0xff] (!%p829_p12)  ;;  %v627_v38 = vmul.f32 (!%p829_p12), %v580_v13, %v580_v13  ;;  %v629_v44 = vmul.f32 (!%p829_p12), %v582_v18, %v582_v18 }
 0x15c   : > { %557 = vst [vmem:[#allocation2 + $0x28] sm:$0xff] %v541_v63  ;;  %565 = vst [vmem:[#allocation2 + $0x68] sm:$0xff] %v549_v0  ;;  %v604_v5 = vadd.f32 (!%p829_p12), %v573_v2, %v572_v1  ;;  %v620_v6 = vmul.f32 (!%p829_p12), %v573_v2, %v573_v2  ;;  %v581_v17 = vld [vmem:[#allocation2 + $0x48] sm:$0xff] (!%p829_p12)  ;;  %v630_v47 = vmul.f32 (!%p829_p12), %v583_v19, %v583_v19 }
 0x15d   : > { %588 = vst [vmem:[#allocation8] sm:$0xff] %v572_v1  ;;  %589 = vst [vmem:[#allocation8 + $0x8] sm:$0xff] %v573_v2  ;;  %v628_v41 = vmul.f32 %v581_v17, %v581_v17 }
 0x15e   : > { %590 = vst [vmem:[#allocation8 + $0x10] sm:$0xff] %v574_v3  ;;  %591 = vst [vmem:[#allocation8 + $0x18] sm:$0xff] %v575_v8  ;;  %v635_v14 = vadd.f32 %v620_v6, %v619_v4  ;;  %v605_v15 = vadd.f32 %v604_v5, %v574_v3 }
 0x15f   : > { %596 = vst [vmem:[#allocation8 + $0x40] sm:$0xff] %v580_v13  ;;  %597 = vst [vmem:[#allocation8 + $0x48] sm:$0xff] %v581_v17 }
 0x160   : > { %v578_v11 = vld [vmem:[#allocation2 + $0x30] sm:$0xff]  ;;  %598 = vst [vmem:[#allocation8 + $0x50] sm:$0xff] %v582_v18  ;;  %599 = vst [vmem:[#allocation8 + $0x58] sm:$0xff] %v583_v19  ;;  %v636_v23 = vadd.f32 %v635_v14, %v621_v7  ;;  %v606_v24 = vadd.f32 %v605_v15, %v575_v8 }
 0x161   : > { %v576_v9 = vld [vmem:[#allocation2 + $0x20] sm:$0xff]  ;;  %594 = vst [vmem:[#allocation8 + $0x30] sm:$0xff] %v578_v11  ;;  %v586_v22 = vld [vmem:[#allocation2 + $0x70] sm:$0xff]  ;;  %v625_v32 = vmul.f32 %v578_v11, %v578_v11 }
 0x162   : > { %592 = vst [vmem:[#allocation8 + $0x20] sm:$0xff] %v576_v9  ;;  %v579_v12 = vld [vmem:[#allocation2 + $0x38] sm:$0xff]  ;;  %v584_v20 = vld [vmem:[#allocation2 + $0x60] sm:$0xff]  ;;  %v623_v25 = vmul.f32 %v576_v9, %v576_v9  ;;  %602 = vst [vmem:[#allocation8 + $0x70] sm:$0xff] %v586_v22  ;;  %v637_v27 = vadd.f32 %v636_v23, %v622_v16  ;;  %v607_v28 = vadd.f32 %v606_v24, %v576_v9 }
 0x163   : > { %v577_v10 = vld [vmem:[#allocation2 + $0x28] sm:$0xff]  ;;  %595 = vst [vmem:[#allocation8 + $0x38] sm:$0xff] %v579_v12  ;;  %600 = vst [vmem:[#allocation8 + $0x60] sm:$0xff] %v584_v20  ;;  %v587_v26 = vld [vmem:[#allocation2 + $0x78] sm:$0xff]  ;;  %v626_v35 = vmul.f32 %v579_v12, %v579_v12  ;;  %v631_v50 = vmul.f32 %v584_v20, %v584_v20  ;;  %v633_v55 = vmul.f32 %v586_v22, %v586_v22 }
 0x164   : > { %593 = vst [vmem:[#allocation8 + $0x28] sm:$0xff] %v577_v10  ;;  %v585_v21 = vld [vmem:[#allocation2 + $0x68] sm:$0xff]  ;;  %603 = vst [vmem:[#allocation8 + $0x78] sm:$0xff] %v587_v26  ;;  %v624_v29 = vmul.f32 %v577_v10, %v577_v10  ;;  %v638_v30 = vadd.f32 %v637_v27, %v623_v25  ;;  %v608_v31 = vadd.f32 %v607_v28, %v577_v10 }
 0x165   : > { %601 = vst [vmem:[#allocation8 + $0x68] sm:$0xff] %v585_v21  ;;  %v632_v53 = vmul.f32 %v585_v21, %v585_v21  ;;  %v634_v58 = vmul.f32 %v587_v26, %v587_v26 }
 0x166   : > { %v639_v33 = vadd.f32 %v638_v30, %v624_v29  ;;  %v609_v34 = vadd.f32 %v608_v31, %v578_v11 }
 0x168   : > { %v640_v36 = vadd.f32 %v639_v33, %v625_v32  ;;  %v610_v37 = vadd.f32 %v609_v34, %v579_v12 }
 0x16a   : > { %v641_v39 = vadd.f32 %v640_v36, %v626_v35  ;;  %v611_v40 = vadd.f32 %v610_v37, %v580_v13 }
 0x16c   : > { %v642_v42 = vadd.f32 %v641_v39, %v627_v38  ;;  %v612_v43 = vadd.f32 %v611_v40, %v581_v17 }
 0x16e   : > { %v643_v45 = vadd.f32 %v642_v42, %v628_v41  ;;  %v613_v46 = vadd.f32 %v612_v43, %v582_v18 }
 0x170   : > { %v644_v48 = vadd.f32 %v643_v45, %v629_v44  ;;  %v614_v49 = vadd.f32 %v613_v46, %v583_v19 }
 0x172   : > { %v645_v51 = vadd.f32 %v644_v48, %v630_v47  ;;  %v615_v52 = vadd.f32 %v614_v49, %v584_v20 }
 0x174   : > { %v616_v54 = vadd.f32 %v615_v52, %v585_v21  ;;  %v646_v56 = vadd.f32 %v645_v51, %v631_v50 }
 0x176   : > { %v617_v57 = vadd.f32 %v616_v54, %v586_v22  ;;  %v647_v59 = vadd.f32 %v646_v56, %v632_v53 }
 0x178   : > { %v618_v60 = vadd.f32 %v617_v57, %v587_v26  ;;  %v648_v61 = vadd.f32 %v647_v59, %v633_v55 }
 0x17a   : > { %650 = vst [vmem:[#allocation9] sm:$0xff] %v618_v60  ;;  %v649_v62 = vadd.f32 %v648_v61, %v634_v58 }
 0x17c   : > { %651 = vst [vmem:[#allocation11] sm:$0xff] %v649_v62 }
 0x17d PF: > { %p1429_p4 = scmp.eq.s32.totalorder %s801_s21, 1  ;;  %s1214_s26 = smov [#allocation9]  }
 0x17e   : > { %s677_s12 = sshll.u32 %s1214_s26, 4  ;;  %s678_s12 = int_to_ptr.vmem [resolvable:$true] %s677_s12 }
 0x17f   : > { %s1066_s13 = scalar_lea.vmem %s678_s12, 128  ;;  %p1073_p10 = scmp.lt.s32.totalorder %s678_s12, %s678_s12 }
 0x180   : > { %p1067_p8 = scmp.ne.s32.totalorder %s678_s12, %s1066_s13  ;;  %p1074_p0 = scmp.lt.s32.totalorder %s1066_s13, %s1066_s13 }
 0x182   : > { %p1068_p2 = pnand %p1067_p8, %p1429_p4  ;;  %p1075_p5 = por %p1074_p0, %p1073_p10 }
 0x184   : > { %p1069_p3 = pneg %p1068_p2 }
 0x186   : > { %p1076_p6 = pnand %p1075_p5, %p1069_p3 }
 0x188   : > { %1079 = shalt.err (!%p1076_p6)
}
 0x189   : > { %s1080_s21 = scalar_lea.hbm %s1516_s3, 128 }
 0x18a   : > { %p1081_p11 = scmp.ne.s32.totalorder %s1516_s3, %s1080_s21  ;;  %p1086_p7 = scmp.lt.u32.totalorder %s1080_s21, %s1516_s3 }
 0x18c   : > { %p1082_p13 = pnand %p1081_p11, %p1429_p4 }
 0x18e   : > { %p1083_p1 = pneg %p1082_p13 }
 0x190   : > { %p1088_p9 = pnand %p1086_p7, %p1083_p1 }
 0x192   : > { %1091 = shalt.err (!%p1088_p9)
}
 0x193   : > { %910 = dma.vmem_to_hbm [thread:$0]  (%p1429_p4), %s678_s12, 128, %s1516_s3, [#allocation10]  }
 0x194   : > { %s1215_s11 = smov [#allocation8]  }
 0x195   : > { %s661_s9 = sshll.u32 %s1215_s11, 4  ;;  %s662_s9 = int_to_ptr.vmem [resolvable:$true] %s661_s9 }
 0x196   : > { %s1092_s6 = scalar_lea.vmem %s662_s9, 2048  ;;  %p1099_p3 = scmp.lt.s32.totalorder %s662_s9, %s662_s9 }
 0x197   : > { %p1093_p12 = scmp.ne.s32.totalorder %s662_s9, %s1092_s6  ;;  %p1100_p10 = scmp.lt.s32.totalorder %s1092_s6, %s1092_s6 }
 0x199   : > { %p1094_p8 = pnand %p1093_p12, %p1429_p4  ;;  %p1101_p0 = por %p1100_p10, %p1099_p3 }
 0x19b   : > { %p1095_p2 = pneg %p1094_p8 }
 0x19d   : > { %p1102_p5 = pnand %p1101_p0, %p1095_p2 }
 0x19f   : > { %1105 = shalt.err (!%p1102_p5)
}
 0x1a0   : > { %s1106_s28 = scalar_lea.hbm %s1515_s2, 2048 }
 0x1a1   : > { %p1107_p6 = scmp.ne.s32.totalorder %s1515_s2, %s1106_s28  ;;  %p1112_p1 = scmp.lt.u32.totalorder %s1106_s28, %s1515_s2 }
 0x1a3   : > { %p1108_p11 = pnand %p1107_p6, %p1429_p4 }
 0x1a5   : > { %p1109_p13 = pneg %p1108_p11 }
 0x1a7   : > { %p1114_p7 = pnand %p1112_p1, %p1109_p13 }
 0x1a9   : > { %1117 = shalt.err (!%p1114_p7)
}
 0x1aa   : > { %s1216_s15 = smov 128   ;;  %s1217_s25 = smov 8  }
 0x1ab   : > { %908 = dma.vmem_to_hbm [thread:$0]  (%p1429_p4), %s662_s9, 2048, %s1515_s2, [#allocation5], %s1216_s15, %s1216_s15, %s1217_s25  }
 0x1ac   : > { %s1218_s7 = smov [#allocation11]  }
 0x1ad   : > { %s690_s23 = sshll.u32 %s1218_s7, 4  ;;  %s691_s23 = int_to_ptr.vmem [resolvable:$true] %s690_s23 }
 0x1ae   : > { %s1118_s30 = scalar_lea.vmem %s691_s23, 128  ;;  %p1125_p2 = scmp.lt.s32.totalorder %s691_s23, %s691_s23 }
 0x1af   : > { %p1119_p9 = scmp.ne.s32.totalorder %s691_s23, %s1118_s30  ;;  %p1126_p3 = scmp.lt.s32.totalorder %s1118_s30, %s1118_s30 }
 0x1b1   : > { %p1120_p12 = pnand %p1119_p9, %p1429_p4  ;;  %p1127_p10 = por %p1126_p3, %p1125_p2 }
 0x1b3   : > { %p1121_p8 = pneg %p1120_p12 }
 0x1b5   : > { %p1128_p0 = pnand %p1127_p10, %p1121_p8 }
 0x1b7   : > { %1131 = shalt.err (!%p1128_p0)
}
 0x1b8   : > { %s1132_s11 = scalar_lea.hbm %s1517_s4, 128 }
 0x1b9   : > { %p1133_p5 = scmp.ne.s32.totalorder %s1517_s4, %s1132_s11  ;;  %p1138_p13 = scmp.lt.u32.totalorder %s1132_s11, %s1517_s4 }
 0x1bb   : > { %p1134_p6 = pnand %p1133_p5, %p1429_p4 }
 0x1bd   : > { %p1135_p11 = pneg %p1134_p6 }
 0x1bf   : > { %p1140_p1 = pnand %p1138_p13, %p1135_p11 }
 0x1c1   : > { %1143 = shalt.err (!%p1140_p1)
}
 0x1c2   : > { %912 = dma.vmem_to_hbm [thread:$0]  (%p1429_p4), %s691_s23, 128, %s1517_s4, [#allocation10]  }
 0x1c3   : > { %1177 = dma.done.wait (%p1429_p4), [#allocation5], 2048  }
 0x1c4   : > { %1179 = vsyncadd (%p1429_p4), [#allocation5], 4294965248 }
 0x1c5   : > { %1181 = dma.done.wait (%p1429_p4), [#allocation10], 256  }
 0x1c6   : > { %1183 = vsyncadd (%p1429_p4), [#allocation10], 4294967040 }
 0x1c7 PF: > { %s23_s20 = sadd.s32 1, %s1206_s20   ;;  %s1526_s15 = smov %s1190_s16 }
 0x1c8   : > { %p20_p7 = scmp.ge.s32.totalorder %s23_s20, 4   ;;  %s1527_s16 = smov %s1194_s17 }
 0x1c9   : > { %s1528_s17 = smov %s1295_s27  ;;  %s1529_s18 = smov %s1202_s19 }
 0x1ca   : > { %s1530_s19 = smov %s1532_s22  ;;  %22 = sbr.rel (!%p20_p7) target bundleno = 8 (0x8), region = 105 }
 0x1d1   :  { %711 = vsyncpa [#allocation4], 1 }
 0x1d2   :  { %713 = vsyncpa [#allocation4 + $0x1], 1 }
 0x1d3   :  { %714 = vsyncpa [#allocation7], 1 }
 0x1d4   :  { %716 = vsyncpa [#allocation7 + $0x1], 1 }
 0x1d5   :  { %717 = vsyncpa [#allocation5], 1 }
 0x1d6   :  { %719 = vsyncpa [#allocation5 + $0x1], 1 }
 0x1d7   :  { %720 = vsyncpa [#allocation10], 1 }

</bundles_post_ra>
